<compile_context>
chip_gen: v5e
topology: v5e:2x2
jax: 0.10.0
libtpu: 0.0.40
codegen_flags: <defaults>
</compile_context>

<pallas_src>
import functools
import math

import jax
import jax.numpy as jnp
from jax.experimental import pallas as pl
from jax.experimental.pallas import tpu as pltpu


def _round_up(a: int, m: int) -> int:
    return (a + m - 1) // m * m


def _keep_threshold(p: float) -> int:
    """uint32 threshold t such that P(bits < t) == 1 - p for uniform uint32 bits."""
    return min(int(round((1.0 - p) * 2.0 ** 32)), 2 ** 32 - 1)


def _bytes(shape, dtype) -> int:
    return math.prod(shape) * jnp.dtype(dtype).itemsize


# ----------------------------- pass 1 kernel ---------------------------------
# H_rows = dropout(relu(G_rows @ (x @ W1 + b1)))
def _hgnn_pass1_kernel(x_ref, w1_ref, b1_ref, g_ref, bits_ref, h_ref, xw1_ref,
                       *, keep_threshold, keep_scale, apply_dropout):
    # Small projection computed once and kept resident in VMEM scratch.  This is
    # why the row-tile grid axis is "arbitrary": the scratch written at step 0 is
    # reused by every later row tile (cannot be split across megacore TCs).
    @pl.when(pl.program_id(0) == 0)
    def _():
        t = jnp.dot(x_ref[...], w1_ref[...], preferred_element_type=jnp.float32)
        xw1_ref[...] = (t + b1_ref[...]).astype(jnp.bfloat16)

    h = jnp.dot(g_ref[...], xw1_ref[...], preferred_element_type=jnp.float32)
    h = jnp.maximum(h, 0.0)                                    # relu (f32, VPU)
    if apply_dropout:
        keep = bits_ref[...] < jnp.uint32(keep_threshold)      # 1 integer compare
        h = jnp.where(keep, h * keep_scale, 0.0)               # train-mode scaling
    h_ref[...] = h.astype(jnp.bfloat16)


# ----------------------------- pass 2 kernel ---------------------------------
# out_rows = G_rows @ (H @ W2 + b2)
def _hgnn_pass2_kernel(h_ref, w2_ref, b2_ref, g_ref, o_ref, hw2_ref):
    @pl.when(pl.program_id(0) == 0)
    def _():
        t = jnp.dot(h_ref[...], w2_ref[...], preferred_element_type=jnp.float32)
        hw2_ref[...] = (t + b2_ref[...]).astype(jnp.bfloat16)

    o_ref[...] = jnp.dot(g_ref[...], hw2_ref[...],
                         preferred_element_type=jnp.float32)


# --------------------------------- wrapper -----------------------------------
def hgnn_forward(x, G, w1, b1, w2, b2, dropout_bits, *, dropout_p=0.5,
                 row_tile=256):
    """HGNN forward.  dropout_bits: uint32 [N, n_hid] uniform random bits."""
    N, in_ch = x.shape
    n_hid = w1.shape[1]
    n_class = w2.shape[1]
    assert G.shape == (N, N)
    assert dropout_bits.shape == (N, n_hid)
    assert dropout_bits.dtype == jnp.uint32

    f32, bf16, u32 = jnp.float32, jnp.bfloat16, jnp.uint32

    # Pad feature dims to 128 lanes (lane-dense stores, full-width MXU tiles) and
    # rows to the row-tile (multiple of 8 sublanes).  Zero padding is exact: the
    # padded rows/cols of G are zero, so they contribute nothing and the padded
    # output region is sliced off at the end.
    in_ch_p = _round_up(in_ch, 128)
    n_hid_p = _round_up(n_hid, 128)
    n_class_p = _round_up(n_class, 128)
    tm = min(_round_up(row_tile, 8), _round_up(N, 8))
    n_pad = _round_up(N, tm)
    grid = (n_pad // tm,)

    x_p = jnp.pad(x.astype(f32), ((0, n_pad - N), (0, in_ch_p - in_ch))).astype(bf16)
    g_p = jnp.pad(G.astype(f32), ((0, n_pad - N), (0, n_pad - N))).astype(bf16)
    w1_p = jnp.pad(w1.astype(f32), ((0, in_ch_p - in_ch), (0, n_hid_p - n_hid))).astype(bf16)
    b1_p = jnp.pad(b1.astype(f32).reshape(1, -1), ((0, 0), (0, n_hid_p - n_hid)))
    w2_p = jnp.pad(w2.astype(f32), ((0, n_hid_p - n_hid), (0, n_class_p - n_class))).astype(bf16)
    b2_p = jnp.pad(b2.astype(f32).reshape(1, -1), ((0, 0), (0, n_class_p - n_class)))
    bits_p = jnp.pad(dropout_bits, ((0, n_pad - N), (0, n_hid_p - n_hid)))

    apply_dropout = dropout_p > 0.0
    keep_threshold = _keep_threshold(dropout_p)
    keep_scale = 1.0 / (1.0 - dropout_p) if apply_dropout else 1.0

    resident = lambda i: (0, 0)   # constant block index -> loaded once, stays in VMEM
    stream = lambda i: (i, 0)     # per-row-tile block -> auto double-buffered DMA

    def _compiler_params(vmem_need):
        return pltpu.CompilerParams(
            # "arbitrary": the step-0 resident scratch is reused by later tiles.
            dimension_semantics=("arbitrary",),
            # Explicit scoped-VMEM limit (v5e default is only 16 MiB); keep it
            # within v7x's 64 MiB physical VMEM.
            vmem_limit_bytes=int(min(max(2 * vmem_need, 32 << 20), 64 << 20)),
        )

    # ---------------- pass 1: H = dropout(relu(G @ (x W1 + b1))) ----------------
    p1_vmem = (2 * _bytes((tm, n_pad), bf16)            # streamed G tile (x2 bufs)
               + 2 * _bytes((tm, n_hid_p), u32)         # streamed dropout bits
               + 2 * _bytes((tm, n_hid_p), bf16)        # streamed H output tile
               + 2 * _bytes((n_pad, in_ch_p), bf16)     # resident x
               + 2 * _bytes((in_ch_p, n_hid_p), bf16)   # resident W1
               + 2 * _bytes((8, n_hid_p), f32)          # resident b1
               + _bytes((n_pad, n_hid_p), bf16))        # xW1 scratch
    p1_cost = pl.CostEstimate(
        flops=2 * n_pad * in_ch_p * n_hid_p + 2 * n_pad * n_pad * n_hid_p,
        transcendentals=0,
        bytes_accessed=(_bytes((n_pad, n_pad), bf16) + _bytes((n_pad, in_ch_p), bf16)
                        + _bytes((in_ch_p, n_hid_p), bf16)
                        + _bytes((n_pad, n_hid_p), u32)
                        + _bytes((n_pad, n_hid_p), bf16)))

    h = pl.pallas_call(
        functools.partial(_hgnn_pass1_kernel, keep_threshold=keep_threshold,
                          keep_scale=keep_scale, apply_dropout=apply_dropout),
        out_shape=jax.ShapeDtypeStruct((n_pad, n_hid_p), bf16),
        grid=grid,
        in_specs=[
            pl.BlockSpec((n_pad, in_ch_p), resident),    # x
            pl.BlockSpec((in_ch_p, n_hid_p), resident),  # W1
            pl.BlockSpec((1, n_hid_p), resident),        # b1
            pl.BlockSpec((tm, n_pad), stream),           # G row tile
            pl.BlockSpec((tm, n_hid_p), stream),         # dropout bits row tile
        ],
        out_specs=pl.BlockSpec((tm, n_hid_p), stream),
        scratch_shapes=[pltpu.VMEM((n_pad, n_hid_p), bf16)],
        compiler_params=_compiler_params(p1_vmem),
        cost_estimate=p1_cost,
    )(x_p, w1_p, b1_p, g_p, bits_p)

    # ---------------- pass 2: out = G @ (H W2 + b2) ------------------------------
    p2_vmem = (2 * _bytes((tm, n_pad), bf16)             # streamed G tile
               + 2 * _bytes((tm, n_class_p), f32)        # streamed output tile
               + 2 * _bytes((n_pad, n_hid_p), bf16)      # resident H
               + 2 * _bytes((n_hid_p, n_class_p), bf16)  # resident W2
               + 2 * _bytes((8, n_class_p), f32)         # resident b2
               + _bytes((n_pad, n_class_p), bf16))       # HW2 scratch
    p2_cost = pl.CostEstimate(
        flops=2 * n_pad * n_hid_p * n_class_p + 2 * n_pad * n_pad * n_class_p,
        transcendentals=0,
        bytes_accessed=(_bytes((n_pad, n_pad), bf16) + _bytes((n_pad, n_hid_p), bf16)
                        + _bytes((n_hid_p, n_class_p), bf16)
                        + _bytes((n_pad, n_class_p), f32)))

    out_p = pl.pallas_call(
        _hgnn_pass2_kernel,
        out_shape=jax.ShapeDtypeStruct((n_pad, n_class_p), f32),
        grid=grid,
        in_specs=[
            pl.BlockSpec((n_pad, n_hid_p), resident),     # H (from pass 1)
            pl.BlockSpec((n_hid_p, n_class_p), resident), # W2
            pl.BlockSpec((1, n_class_p), resident),       # b2
            pl.BlockSpec((tm, n_pad), stream),            # G row tile
        ],
        out_specs=pl.BlockSpec((tm, n_class_p), stream),
        scratch_shapes=[pltpu.VMEM((n_pad, n_class_p), bf16)],
        compiler_params=_compiler_params(p2_vmem),
        cost_estimate=p2_cost,
    )(h, w2_p, b2_p, g_p)

    return out_p[:N, :n_class]


def init_hgnn_params(key, in_ch, n_hid, n_class):
    """Uniform(-stdv, stdv) init matching HGNN_conv.reset_parameters."""
    k1, k2, k3, k4 = jax.random.split(key, 4)
    stdv1 = 1.0 / jnp.sqrt(jnp.float32(n_hid))
    stdv2 = 1.0 / jnp.sqrt(jnp.float32(n_class))
    w1 = jax.random.uniform(k1, (in_ch, n_hid), jnp.float32, -stdv1, stdv1)
    b1 = jax.random.uniform(k2, (n_hid,), jnp.float32, -stdv1, stdv1)
    w2 = jax.random.uniform(k3, (n_hid, n_class), jnp.float32, -stdv2, stdv2)
    b2 = jax.random.uniform(k4, (n_class,), jnp.float32, -stdv2, stdv2)
    return w1, b1, w2, b2


if __name__ == "__main__":
    # Small synthetic problem: N=16 nodes, in_ch=32 features, hidden=32, 16 classes.
    N, in_ch, n_hid, n_class = 16, 32, 32, 16
    p = 0.5

    key = jax.random.PRNGKey(0)
    kx, kg, kp, kd = jax.random.split(key, 4)

    x = jax.random.normal(kx, (N, in_ch), dtype=jnp.float32)
    G_raw = jax.random.uniform(kg, (N, N), dtype=jnp.float32)
    G = (G_raw + G_raw.T) * (0.5 / jnp.sqrt(jnp.float32(N)))   # symmetric "Laplacian"

    w1, b1, w2, b2 = init_hgnn_params(kp, in_ch, n_hid, n_class)
    dropout_bits = jax.random.bits(kd, (N, n_hid), dtype=jnp.uint32)

    # row_tile=8 so the demo actually exercises the streamed grid (grid=(2,)).
    out = hgnn_forward(x, G, w1, b1, w2, b2, dropout_bits, dropout_p=p, row_tile=8)
    out = jax.block_until_ready(out)

    # Pure-JAX f32 reference with the identical dropout mask (kernel uses bf16 MXU
    # inputs with f32 accumulation, hence the loose tolerance).
    keep = dropout_bits < jnp.uint32(_keep_threshold(p))
    h_ref = jnp.maximum(G @ (x @ w1 + b1), 0.0)
    h_ref = jnp.where(keep, h_ref / (1.0 - p), 0.0)
    ref = G @ (h_ref @ w2 + b2)

    assert out.shape == (N, n_class)
    assert bool(jnp.all(jnp.isfinite(out)))
    assert bool(jnp.allclose(out, ref, atol=5e-2, rtol=5e-2))
    print("KERNEL_OK")
</pallas_src>

<mosaic_0001>
module attributes {stable_mosaic.version = 11 : i64} {
  func.func @_hgnn_pass1_kernel(%arg0: i32, %arg1: memref<16x128xbf16, #tpu.memory_space<vmem>>, %arg2: memref<128x128xbf16, #tpu.memory_space<vmem>>, %arg3: memref<1x128xf32, #tpu.memory_space<vmem>>, %arg4: memref<8x16xbf16, #tpu.memory_space<vmem>>, %arg5: memref<8x128xi32, #tpu.memory_space<vmem>>, %arg6: memref<8x128xbf16, #tpu.memory_space<vmem>>, %arg7: memref<16x128xbf16, #tpu.memory_space<vmem>>) attributes {dimension_semantics = [#tpu.dimension_semantics<arbitrary>], iteration_bounds = array<i64: 2>, scalar_prefetch = 0 : i64, scratch_operands = 1 : i64, tpu.core_type = #tpu.core_type<tc>, window_params = [{pipeline_mode = #tpu.pipeline_mode<synchronous>, transform_indices = @transform_0, window_bounds = array<i64: 16, 128>}, {pipeline_mode = #tpu.pipeline_mode<synchronous>, transform_indices = @transform_1, window_bounds = array<i64: 128, 128>}, {pipeline_mode = #tpu.pipeline_mode<synchronous>, transform_indices = @transform_2, window_bounds = array<i64: 1, 128>}, {transform_indices = @transform_3, window_bounds = array<i64: 8, 16>}, {transform_indices = @transform_4, window_bounds = array<i64: 8, 128>}, {transform_indices = @transform_5, window_bounds = array<i64: 8, 128>}]} {
    %c0_i32 = arith.constant 0 : i32
    %0 = arith.cmpi eq, %arg0, %c0_i32 : i32
    %1 = arith.extui %0 : i1 to i32
    %c0_i32_0 = arith.constant 0 : i32
    %2 = arith.cmpi ne, %1, %c0_i32_0 : i32
    scf.if %2 {
      %c0_11 = arith.constant 0 : index
      %c0_12 = arith.constant 0 : index
      %17 = vector.load %arg1[%c0_11, %c0_12] : memref<16x128xbf16, #tpu.memory_space<vmem>>, vector<16x128xbf16>
      %c0_13 = arith.constant 0 : index
      %c0_14 = arith.constant 0 : index
      %18 = vector.load %arg2[%c0_13, %c0_14] : memref<128x128xbf16, #tpu.memory_space<vmem>>, vector<128x128xbf16>
      %cst_15 = arith.constant dense<0.000000e+00> : vector<16x128xf32>
      %19 = tpu.matmul %17, %18, %cst_15 {dimension_numbers = #tpu.dot_dimension_numbers<[1], [0], [0], [1], [0, 0, 1, 1], [], []>} : vector<16x128xbf16>, vector<128x128xbf16>, vector<16x128xf32> -> vector<16x128xf32>
      %c0_16 = arith.constant 0 : index
      %c0_17 = arith.constant 0 : index
      %20 = vector.load %arg3[%c0_16, %c0_17] : memref<1x128xf32, #tpu.memory_space<vmem>>, vector<1x128xf32>
      %21 = vector.broadcast %20 : vector<1x128xf32> to vector<16x128xf32>
      %22 = arith.addf %19, %21 : vector<16x128xf32>
      %23 = arith.truncf %22 : vector<16x128xf32> to vector<16x128xbf16>
      %c0_18 = arith.constant 0 : index
      %c0_19 = arith.constant 0 : index
      %24 = vector.load %arg7[%c0_18, %c0_19] : memref<16x128xbf16, #tpu.memory_space<vmem>>, vector<16x128xbf16>
      tpu.vector_store %arg7[%c0_18, %c0_19], %23 {strides = array<i32>} : memref<16x128xbf16, #tpu.memory_space<vmem>>, vector<16x128xbf16>,
    } else {
    }
    %c0 = arith.constant 0 : index
    %c0_1 = arith.constant 0 : index
    %3 = vector.load %arg4[%c0, %c0_1] : memref<8x16xbf16, #tpu.memory_space<vmem>>, vector<8x16xbf16>
    %c0_2 = arith.constant 0 : index
    %c0_3 = arith.constant 0 : index
    %4 = vector.load %arg7[%c0_2, %c0_3] : memref<16x128xbf16, #tpu.memory_space<vmem>>, vector<16x128xbf16>
    %cst = arith.constant dense<0.000000e+00> : vector<8x128xf32>
    %5 = tpu.matmul %3, %4, %cst {dimension_numbers = #tpu.dot_dimension_numbers<[1], [0], [0], [1], [0, 0, 1, 1], [], []>} : vector<8x16xbf16>, vector<16x128xbf16>, vector<8x128xf32> -> vector<8x128xf32>
    %cst_4 = arith.constant 0.000000e+00 : f32
    %6 = vector.broadcast %cst_4 : f32 to vector<8x128xf32>
    %7 = arith.maximumf %5, %6 : vector<8x128xf32>
    %c0_5 = arith.constant 0 : index
    %c0_6 = arith.constant 0 : index
    %8 = vector.load %arg5[%c0_5, %c0_6] : memref<8x128xi32, #tpu.memory_space<vmem>>, vector<8x128xi32>
    %c-2147483648_i32 = arith.constant -2147483648 : i32
    %9 = vector.broadcast %c-2147483648_i32 : i32 to vector<8x128xi32>
    %10 = arith.cmpi ult, %8, %9 : vector<8x128xi32>
    %cst_7 = arith.constant 2.000000e+00 : f32
    %11 = vector.broadcast %cst_7 : f32 to vector<8x128xf32>
    %12 = arith.mulf %7, %11 : vector<8x128xf32>
    %cst_8 = arith.constant 0.000000e+00 : f32
    %13 = vector.broadcast %cst_8 : f32 to vector<8x128xf32>
    %14 = arith.select %10, %12, %13 : vector<8x128xi1>, vector<8x128xf32>
    %15 = arith.truncf %14 : vector<8x128xf32> to vector<8x128xbf16>
    %c0_9 = arith.constant 0 : index
    %c0_10 = arith.constant 0 : index
    %16 = vector.load %arg6[%c0_9, %c0_10] : memref<8x128xbf16, #tpu.memory_space<vmem>>, vector<8x128xbf16>
    tpu.vector_store %arg6[%c0_9, %c0_10], %15 {strides = array<i32>} : memref<8x128xbf16, #tpu.memory_space<vmem>>, vector<8x128xbf16>,
    return
  }
  func.func @transform_0(%arg0: i32) -> (i32, i32) {
    %c0_i32 = arith.constant 0 : i32
    %c0_i32_0 = arith.constant 0 : i32
    %c0_i32_1 = arith.constant 0 : i32
    return %c0_i32, %c0_i32_0 : i32, i32
  }
  func.func @transform_1(%arg0: i32) -> (i32, i32) {
    %c0_i32 = arith.constant 0 : i32
    %c0_i32_0 = arith.constant 0 : i32
    %c0_i32_1 = arith.constant 0 : i32
    return %c0_i32, %c0_i32_0 : i32, i32
  }
  func.func @transform_2(%arg0: i32) -> (i32, i32) {
    %c0_i32 = arith.constant 0 : i32
    %c0_i32_0 = arith.constant 0 : i32
    %c0_i32_1 = arith.constant 0 : i32
    return %c0_i32, %c0_i32_0 : i32, i32
  }
  func.func @transform_3(%arg0: i32) -> (i32, i32) {
    %c0_i32 = arith.constant 0 : i32
    %c0_i32_0 = arith.constant 0 : i32
    return %arg0, %c0_i32 : i32, i32
  }
  func.func @transform_4(%arg0: i32) -> (i32, i32) {
    %c0_i32 = arith.constant 0 : i32
    %c0_i32_0 = arith.constant 0 : i32
    return %arg0, %c0_i32 : i32, i32
  }
  func.func @transform_5(%arg0: i32) -> (i32, i32) {
    %c0_i32 = arith.constant 0 : i32
    %c0_i32_0 = arith.constant 0 : i32
    return %arg0, %c0_i32 : i32, i32
  }
}

</mosaic_0001>

<bundles_post_ra>
// kernel: tpu_custom_call.1
= control target key start
LH: loop header
LB: loop body
LE: loop exit
PB: predicated region body
PF: predicated region fallthrough
CT: control target
= control target key end

     0   :  { %s1151_s0 = inlined_call_operand.hbm [shape: bf16[16,128], index: 0, kind: input, shape index: {}]   ;;  %s1152_s1 = inlined_call_operand.hbm [shape: bf16[128,128], index: 1, kind: input, shape index: {}]   ;;  %s1153_s2 = inlined_call_operand.vmem [shape: f32[1,128], index: 2, kind: input, shape index: {}]   ;;  %s1154_s3 = inlined_call_operand.hbm [shape: bf16[16,16], index: 3, kind: input, shape index: {}]   ;;  %s1155_s4 = inlined_call_operand.hbm [shape: u32[16,128], index: 4, kind: input, shape index: {}]   ;;  %s1156_s5 = inlined_call_operand.hbm [shape: bf16[16,128], index: 5, kind: output, shape index: {}]  }
   0x1   :  { %1161 = sst [smem:[#allocation17_spill]] %s1151_s0 }
   0x2   :  { %1162 = sst [smem:[#allocation18_spill]] %s1152_s1 }
   0x3   :  { %1163 = sst [smem:[#allocation19_spill]] %s1154_s3 }
   0x4   :  { %10 = vsyncpa [#allocation4], 0 }
   0x5   :  { %11 = vsyncpa [#allocation7], 0 }
   0x6   :  { %12 = vsyncpa [#allocation5], 0 }
   0x7   :  { %14 = vsyncpa [#allocation5 + $0x1], 0  ;;  %s950_s18 = smov 0   ;;  %s952_s19 = smov 0  }
   0x8   :  { %s954_s20 = smov 0   ;;  %s956_s21 = smov 0  }
   0x9 LB: > { %1164 = sst [smem:[#allocation15_spill]] %s910_s20  ;;  %s971_s22 = sadd.s32 4294967295, %s914_s21   ;;  %s914_s21 = sphi %s956_s21, %s1187_s21   ;;  %s910_s20 = sphi %s954_s20, %s1184_s20   ;;  %s906_s19 = sphi %s952_s19, %s1186_s19   ;;  %s902_s18 = sphi %s950_s18, %s1185_s18  }
   0xa   : > { %s568_s23 = sadd.s32 4294967294, %s914_s21   ;;  %p103_p0 = scmp.ne.s32.totalorder %s906_s19, %s902_s18 }
   0xb   : > { %p1159_p1 = scmp.eq.s32.totalorder %s971_s22, 0  ;;  %p153_p2 = scmp.eq.s32.totalorder %s971_s22, 1 }
   0xc   : > { %p159_p3 = scmp.eq.s32.totalorder %s568_s23, 1  ;;  %p569_p5 = scmp.ge.s32.totalorder %s914_s21, 1 }
   0xd   : > { %p980_p4 = por %p1159_p1, %p103_p0  ;;  %p166_p7 = scmp.lt.s32.totalorder %s914_s21, 3 }
   0xe   : > { %p985_p6 = por %p159_p3, %p103_p0  ;;  %s1167_s0 = sld [smem:[#allocation17_spill]] }
   0xf   : > { %p994_p9 = pnand %p569_p5, %p166_p7  ;;  %s916_s30 = smov [#allocation3]  }
  0x10   : > { %s179_s6 = sshll.u32 %s916_s30, 4  ;;  %s1008_s8 = sadd.s32 1, %s914_s21   ;;  %s180_s6 = int_to_ptr.vmem [resolvable:$true] %s179_s6 }
  0x11   : > { %p659_p10 = pneg %p994_p9  ;;  %s1157_s9 = smov 64  }
  0x12   : > { %s1158_s10 = smov 4   ;;  %s87_s11 = ssub.s32 %s914_s21, %s1008_s8 }
  0x13   : > { %p1002_p11 = pnand %p659_p10, %p1159_p1  ;;  %s90_s12 = sadd.s32 1, %s910_s20 }
  0x14   : > { %s177_s28 = sshll.u32 %s1167_s0, 4  ;;  %p88_p13 = scmp.eq.s32.totalorder %s87_s11, 0  ;;  %s178_s28 = int_to_ptr.hbm [resolvable:$true] %s177_s28 }
  0x15   : > { %662 = dma.hbm_to_vmem [thread:$0]  (!%p1002_p11), %s178_s28, 128, %s180_s6, [#allocation4], %s1157_s9, %s1157_s9, %s1158_s10  }
  0x16   : > { %p97_p0 = scmp.ne.s32.totalorder %s910_s20, %s906_s19  ;;  %p98_p3 = scmp.eq.s32.totalorder %s914_s21, 0 }
  0x17   : > { %p679_p5 = scmp.lt.s32.totalorder %s914_s21, 2  ;;  %s210_s15 = sand.u32 1, %s914_s21  }
  0x18   : > { %s1023_s13 = scalar_select %p88_p13, %s910_s20, %s90_s12  }
  0x19   : > { %p99_p7 = por %p98_p3, %p97_p0  ;;  %p1027_p10 = por %p153_p2, %p97_p0 }
  0x1a   : > { %1170 = sst [smem:[#allocation16_spill]] %s1023_s13  ;;  %s212_s16 = sand.u32 1, %s910_s20  }
  0x1b   : > { %s573_s17 = sshll.u32 %s212_s16, 2  ;;  %s574_s23 = sshll.u32 %s914_s21, 2 }
  0x1c   : > { %s1172_s3 = sld [smem:[#allocation19_spill]]  ;;  %s214_s30 = scalar_lea.vmem [#allocation8], %s573_s17 }
  0x1d   : > { %s222_s6 = sshll.u32 %s214_s30, 4  ;;  %p1039_p13 = pnand %p679_p5, %p99_p7  ;;  %s223_s6 = int_to_ptr.vmem [resolvable:$true] %s222_s6 }
  0x1e   : > { %s1174_s1 = sld [smem:[#allocation18_spill]]  ;;  %s1046_s13 = scalar_lea.sflag [#allocation4], %s210_s15 }
  0x1f   : > { %p754_p0 = pneg %p1039_p13 }
  0x22   : > { %s218_s28 = scalar_lea.hbm %s1172_s3, %s574_s23  ;;  %s757_s9 = scalar_lea.hbm %s1172_s3, 8 }
  0x23   : > { %s220_s11 = sshll.u32 %s218_s28, 4  ;;  %s221_s11 = int_to_ptr.hbm [resolvable:$true] %s220_s11 }
  0x24   : > { %s191_s0 = sshll.u32 %s1174_s1, 4  ;;  %s750_s23 = sshra.s32 %s221_s11, 4  ;;  %s192_s0 = int_to_ptr.hbm [resolvable:$true] %s191_s0  ;;  %s751_s23 = int_to_ptr.hbm [resolvable:$true] %s750_s23 }
  0x25   : > { %s752_s17 = scalar_lea.hbm %s751_s23, 4  ;;  %p758_p7 = scmp.lt.s32.totalorder %s751_s23, %s1172_s3 }
  0x26   : > { %p753_p2 = scmp.ne.s32.totalorder %s751_s23, %s752_s17  ;;  %p759_p12 = scmp.lt.s32.totalorder %s757_s9, %s752_s17 }
  0x28   : > { %p755_p3 = pnand %p754_p0, %p753_p2  ;;  %p760_p8 = por %p759_p12, %p758_p7 }
  0x2a   : > { %p756_p5 = pneg %p755_p3 }
  0x2c   : > { %p761_p1 = pnand %p760_p8, %p756_p5 }
  0x2e   : > { %764 = shalt.err (!%p761_p1)
}
  0x2f   : > { %669 = dma.hbm_to_vmem [thread:$0]  (!%p1039_p13), %s221_s11, 64, %s223_s6, %s1046_s13  }
  0x30   : > { %s919_s15 = smov [#allocation6]   ;;  %s575_s1 = sshll.u32 %s212_s16, 3 }
  0x31   : > { %s193_s30 = sshll.u32 %s919_s15, 4  ;;  %s1175_s26 = smov 4   ;;  %s194_s30 = int_to_ptr.vmem [resolvable:$true] %s193_s30 }
  0x32   : > { %s1176_s27 = smov 64   ;;  %s576_s23 = sshll.u32 %s914_s21, 3 }
  0x33   : > { %665 = dma.hbm_to_vmem [thread:$0]  (!%p1002_p11), %s192_s0, 1024, %s194_s30, [#allocation7], %s1176_s27, %s1176_s27, %s1175_s26  }
  0x34   : > { %s233_s17 = scalar_lea.vmem [#allocation9], %s575_s1  ;;  %s237_s3 = scalar_lea.hbm %s1155_s4, %s576_s23 }
  0x35   : > { %s241_s9 = sshll.u32 %s233_s17, 4  ;;  %s239_s20 = sshll.u32 %s237_s3, 4  ;;  %s242_s9 = int_to_ptr.vmem [resolvable:$true] %s241_s9  ;;  %s240_s20 = int_to_ptr.hbm [resolvable:$true] %s239_s20 }
  0x36   : > { %s810_s6 = sshra.s32 %s240_s20, 4  ;;  %s817_s1 = scalar_lea.hbm %s1155_s4, 16  ;;  %s811_s6 = int_to_ptr.hbm [resolvable:$true] %s810_s6 }
  0x37   : > { %s812_s11 = scalar_lea.hbm %s811_s6, 8  ;;  %p818_p11 = scmp.lt.s32.totalorder %s811_s6, %s1155_s4 }
  0x38   : > { %p813_p1 = scmp.ne.s32.totalorder %s811_s6, %s812_s11  ;;  %p819_p2 = scmp.lt.s32.totalorder %s817_s1, %s812_s11 }
  0x3a   : > { %p815_p8 = pnand %p813_p1, %p754_p0  ;;  %p820_p3 = por %p819_p2, %p818_p11 }
  0x3c   : > { %p816_p12 = pneg %p815_p8 }
  0x3e   : > { %p821_p5 = pnand %p820_p3, %p816_p12 }
  0x40   : > { %824 = shalt.err (!%p821_p5)
}
  0x41   : > { %672 = dma.hbm_to_vmem [thread:$0]  (!%p1039_p13), %s240_s20, 128, %s242_s9, %s1046_s13  }
  0x42   : > { %250 = sbr.rel (%p994_p9) target bundleno = 404 (0x194), region = 40  ;;  %p1177_p0 = scmp.eq.s32.totalorder (!%p994_p9), %s971_s22, 0 }
  0x47   : > { %885 = dma.done.wait (%p1177_p0), [#allocation4], 128   ;;  %p1178_p7 = pmov %p1177_p0 }
  0x48   : > { %p1179_p1 = pmov %p1177_p0 }
  0x49   : > { %887 = vsyncadd (%p1178_p7), [#allocation4], 4294967168 }
  0x4a   : > { %889 = dma.done.wait (%p1179_p1), [#allocation7], 1024   ;;  %p1180_p8 = pmov %p1177_p0 }
  0x4b   : > { %s262_s3 = sand.u32 1, %s971_s22   ;;  %s1095_s20 = sand.u32 1, %s906_s19  }
  0x4c   : > { %891 = vsyncadd (%p1180_p8), [#allocation7], 4294966272  ;;  %s580_s29 = sshll.u32 %s1095_s20, 2  ;;  %s263_s13 = scalar_lea.sflag [#allocation4], %s262_s3 }
  0x4d   : > { %s1098_s12 = scalar_lea.vmem [#allocation8], %s580_s29 }
  0x4e   : > { %893 = dma.done.wait (%p980_p4), %s263_s13, 192  }
  0x4f   : > { %895 = vsyncadd (%p980_p4), %s263_s13, 4294967104  ;;  %s581_s30 = sshll.u32 %s1095_s20, 3  ;;  %s1107_s27 = scalar_lea.vmem [#allocation10], %s580_s29 }
  0x50   : > { %s1105_s26 = scalar_lea.vmem [#allocation9], %s581_s30  ;;  %p1181_p9 = scmp.ne.s32.totalorder %s971_s22, 0 }
  0x52   : > { %313 = sbr.rel (%p1181_p9) target bundleno = 258 (0x102), region = 60 }
  0x57   : > { %v638_v0 = vld [vmem:[#allocation6 + $0x38] sm:$0xff]  ;;  %v637_v1 = vld [vmem:[#allocation6 + $0x30] sm:$0xff]  ;;  %v636_v2 = vld [vmem:[#allocation6 + $0x28] sm:$0xff] }
  0x58   : > { %390 = vmatpush.bf16.msra.mxu0 %v638_v0  ;;  %v635_v3 = vld [vmem:[#allocation6 + $0x20] sm:$0xff]  ;;  %v634_v4 = vld [vmem:[#allocation6 + $0x18] sm:$0xff]  ;;  %v633_v5 = vld [vmem:[#allocation6 + $0x10] sm:$0xff] }
  0x59   : > { %v632_v6 = vld [vmem:[#allocation6 + $0x8] sm:$0xff]  ;;  %v631_v7 = vld [vmem:[#allocation6] sm:$0xff]  ;;  %v630_v8 = vld [vmem:[#allocation3] sm:$0xff] }
  0x5a   : > { %v719_v10 = vld [vmem:[%s1153_s2] ss:$0 sm:$0xff] }
  0x5c   : > { %391 = vmatpush.bf16.msra.mxu0 %v637_v1 }
  0x60   : > { %392 = vmatpush.bf16.msra.mxu0 %v636_v2 }
  0x64   : > { %393 = vmatpush.bf16.msra.mxu0 %v635_v3 }
  0x68   : > { %394 = vmatpush.bf16.msra.mxu0 %v634_v4 }
  0x6c   : > { %395 = vmatpush.bf16.msra.mxu0 %v633_v5 }
  0x70   : > { %396 = vmatpush.bf16.msra.mxu0 %v632_v6 }
  0x74   : > { %397 = vmatpush.bf16.msra.mxu0 %v631_v7 }
  0x77   : > { %398 = vmatmul.bf16.vlgmr.msra.gmra.mxu0 %v630_v8 }
  0xf4   : > { %v399_v9 = vpop.f32.mrf.mxu0 }
  0xf5   : > { %v400_v12 = vadd.f32 %v719_v10, %v399_v9 }
  0xfc   : > { %v401_v11 = vpop.f32.mrf.mxu0 }
  0xfd   : > { %v402_v13 = vadd.f32 %v719_v10, %v401_v11 }
  0xff   : > { %v643_v14 = vpack.c.bf16 %v402_v13, %v400_v12 }
 0x101   : > { %644 = vst [vmem:[#allocation2] sm:$0xff] %v643_v14  }
 0x102 PF: > { %v408_v16 = vld [vmem:[%s1098_s12] sm:$0xf]  ;;  %vm417_vm0 = vcmask 130048   ;;  %v435_v17 = vld [vmem:[%s1105_s26] sm:$0xff]  ;;  %s627_s17 = sshll.u32 %s971_s22, 2  ;;  %s456_s6 = sshll.u32 %s1107_s27, 4  ;;  %s457_s6 = int_to_ptr.vmem [resolvable:$true] %s456_s6 }
 0x103   : > { %v625_v18 = vxor.u32 2147483648, %v435_v17  ;;  %s454_s28 = scalar_lea.hbm %s1156_s5, %s627_s17  ;;  %s444_s7 = scalar_lea.sflag [#allocation5], %s1095_s20 }
 0x104   : > { %s458_s11 = sshll.u32 %s454_s28, 4  ;;  %s860_s15 = scalar_lea.hbm %s1156_s5, 8  ;;  %s459_s11 = int_to_ptr.hbm [resolvable:$true] %s458_s11 }
 0x105   : > { %vm438_vm1 = vcmp.lt.s32.totalorder %v625_v18, 0  ;;  %s854_s22 = sshra.s32 %s459_s11, 4  ;;  %s855_s22 = int_to_ptr.hbm [resolvable:$true] %s854_s22 }
 0x106   : > { %s856_s0 = scalar_lea.hbm %s855_s22, 4  ;;  %p861_p11 = scmp.lt.s32.totalorder %s855_s22, %s1156_s5 }
 0x107   : > { %p857_p4 = scmp.ne.s32.totalorder %s855_s22, %s856_s0  ;;  %p862_p2 = scmp.lt.s32.totalorder %s860_s15, %s856_s0 }
 0x108   : > { %v639_v15 = vld [vmem:[#allocation2] sm:$0xff] }
 0x109   : > { %428 = vmatpush.bf16.msra.mxu0 %v639_v15  ;;  %p858_p13 = pnand %p857_p4, %p1027_p10  ;;  %p863_p3 = por %p862_p2, %p861_p11 }
 0x10b   : > { %p859_p12 = pneg %p858_p13 }
 0x10c   : > { %624 = vmatmul.msk.bf16.vlgmr.msra.gmra.mxu0 %vm417_vm0, %v408_v16 }
 0x10d   : > { %p864_p5 = pnand %p863_p3, %p859_p12 }
 0x189   : > { %v430_v19 = vpop.f32.mrf.mxu0 }
 0x18a   : > { %v434_v20 = vmax.f32 %v430_v19, 0.0 }
 0x18c   : > { %v439_v21 = vmul.f32 2.0, %v434_v20 }
 0x18e   : > { %v440_v22 = vsel %vm438_vm1, %v439_v21, 0.0 }
 0x18f   : > { %v441_v23 = vpack.c.bf16 %v440_v22, %v440_v22 }
 0x191   : > { %442 = vst [vmem:[%s1107_s27] sm:$0xf] %v441_v23  ;;  %v432_v24 = vpop.f32.mrf.mxu0 }
 0x192   : > { %867 = shalt.err (!%p864_p5)
}
 0x193   : > { %657 = dma.vmem_to_hbm [thread:$0]  (%p1027_p10), %s457_s6, 64, %s459_s11, %s444_s7  }
 0x194 PF: > { %s470_s20 = sand.u32 1, %s902_s18   ;;  %p1182_p0 = scmp.ge.s32.totalorder %s914_s21, 2 }
 0x195   : > { %s471_s13 = scalar_lea.sflag [#allocation5], %s470_s20 }
 0x196   : > { %p674_p7 = pnand %p1182_p0, %p985_p6 }
 0x198   : > { %p675_p1 = pneg %p674_p7 }
 0x19a   : > { %897 = dma.done.wait (%p675_p1), %s471_s13, 64  }
 0x19b   : > { %899 = vsyncadd (%p675_p1), %s471_s13, 4294967232  ;;  %s1183_s12 = sld [smem:[#allocation15_spill]]  ;;  %p17_p8 = scmp.ge.s32.totalorder %s1008_s8, 4  }
 0x19c   : > { %s1184_s20 = sld [smem:[#allocation16_spill]]  ;;  %s1185_s18 = smov %s906_s19 }
 0x19d   : > { %s1187_s21 = smov %s1008_s8  ;;  %19 = sbr.rel (!%p17_p8) target bundleno = 9 (0x9), region = 107 }
 0x1a1   : > { %s1186_s19 = smov %s1183_s12 }
 0x1a2   :  { %477 = vsyncpa [#allocation4], 1 }
 0x1a3   :  { %479 = vsyncpa [#allocation4 + $0x1], 1 }
 0x1a4   :  { %480 = vsyncpa [#allocation7], 1 }
 0x1a5   :  { %481 = vsyncpa [#allocation5], 1 }
 0x1a6   :  { %483 = vsyncpa [#allocation5 + $0x1], 1 }

</bundles_post_ra>
